<compile_context>
chip_gen: v7x
topology: tpu7x:2x2x1
jax: 0.10.0
libtpu: 0.0.40
codegen_flags: <defaults>
</compile_context>

<pallas_src>
import functools

import jax
import jax.numpy as jnp
from jax import lax
from jax.experimental import pallas as pl
from jax.experimental.pallas import tpu as pltpu


def _dwconv_bn_kernel(x_ref, w_ref, b_ref, m_ref, o_ref, *, H, W, k, d, relu):
    # x_ref: (1, tC, H*W)   activations (any float dtype; upcast once)
    # w_ref: (tC, k*k) f32  BN-scale-folded depthwise weights
    # b_ref: (tC, 1)   f32  folded BN bias
    # m_ref: (k*k, H*W) f32 {0,1} out-of-image masks (one per tap)
    # o_ref: (1, tC, H*W)
    HW = H * W
    c = k // 2

    x = x_ref[0].astype(jnp.float32)           # (tC, HW), loaded/upcast once
    w = w_ref[...]                             # (tC, k*k)   hoisted
    m = m_ref[...]                             # (k*k, HW)   hoisted

    # Start the accumulator from the folded BN bias -> no separate bias add.
    acc = jnp.broadcast_to(b_ref[...], x.shape)

    # k*k-tap shifted-window multiply-accumulate.  Vertical+horizontal shift is a
    # single static lane rotation (XLU); wrap-around garbage is killed by the
    # per-tap mask, so no halo / padded scratch is needed.
    for i in range(k):
        for j in range(k):
            t = i * k + j
            s = ((i - c) * W + (j - c)) * d              # flat source offset
            win = x if s == 0 else pltpu.roll(x, (-s) % HW, axis=1)
            if (i, j) != (c, c):
                win = win * m[t:t + 1, :]                # zero out-of-image lanes
            acc = acc + win * w[:, t:t + 1]
    if relu:
        acc = jnp.maximum(acc, 0.0)
    o_ref[0] = acc.astype(o_ref.dtype)


def _vmem_capacity_bytes():
    try:
        info = pltpu.get_tpu_info()
        cap = getattr(info, "vmem_capacity_bytes", None)
        if cap:
            return int(cap)
    except Exception:
        pass
    return 64 << 20  # conservative default (v7x per-core physical VMEM)


def _choose_c_tile(C, HW, in_isz, out_isz, budget_bytes):
    # Live bytes per channel per grid step: double-buffered input + output blocks
    # plus ~4 f32-wide temporaries (acc / rolled window / masked window).
    per_c = HW * (2 * in_isz + 2 * out_isz + 4 * 4)
    max_tc = max(1, int(budget_bytes // max(per_c, 1)))
    if C <= max_tc:
        return C
    if C % 8 == 0 and max_tc >= 8:
        tc = max_tc - max_tc % 8
        while C % tc:
            tc -= 8
        return max(tc, 8)
    # Tiling rule: a partial-C block must be a multiple of 8 (or the full C).
    return C


def dwconv_bn(x_nchw, weight, gamma, beta, running_mean, running_var,
              *, k=3, d=1, relu=False, eps=1e-5):
    """DWConv.forward.  x_nchw: (N,C,H,W).  weight: (C,1,k,k) depthwise filter."""
    N, C, H, W = x_nchw.shape
    HW = H * W
    KK = k * k
    c = k // 2

    # Free (bitcast) reshape: merge contiguous minor dims; no transpose, no HBM pass.
    x = x_nchw.reshape(N, C, HW)

    # Fold BN:  y = conv(x, w*s) + (beta - mean*s),  s = gamma / sqrt(var + eps).
    scale = (gamma / jnp.sqrt(running_var + eps)).astype(jnp.float32)
    w_eff = weight.reshape(C, KK).astype(jnp.float32) * scale[:, None]          # (C, k*k)
    b_eff = (beta.astype(jnp.float32)
             - running_mean.astype(jnp.float32) * scale).reshape(C, 1)          # (C, 1)

    # Per-tap {0,1} lane masks zeroing out-of-image contributions of rolled windows
    # (replaces halo padding; one extra vmul per non-center tap).
    hw = jnp.arange(HW, dtype=jnp.int32)
    hh, ww = hw // W, hw % W
    masks = []
    for i in range(k):
        for j in range(k):
            di, dj = (i - c) * d, (j - c) * d
            valid = ((hh + di >= 0) & (hh + di < H) &
                     (ww + dj >= 0) & (ww + dj < W))
            masks.append(valid.astype(jnp.float32))
    m = jnp.stack(masks)                                                        # (k*k, H*W)

    # Generation-aware VMEM budget and a C tile that keeps blocks well inside it.
    # (For extremely large H*W with tiny C, an additional lane-dim row tiling with
    #  overlapping halos could be added; not needed at these shapes.)
    cap = int(_vmem_capacity_bytes() * 0.75)          # ~48 MiB v7x, ~96 MiB v5e/v6e
    in_isz = jnp.dtype(x_nchw.dtype).itemsize
    tC = _choose_c_tile(C, HW, in_isz, in_isz, cap // 4)
    n_cblk = C // tC

    per_step = (HW * tC * (2 * in_isz + 2 * in_isz + 4 * 4)
                + 2 * KK * HW * 4 + 2 * C * (KK + 1) * 4)
    vmem_limit = int(min(max(2 * per_step, 16 << 20), cap))

    kern = functools.partial(_dwconv_bn_kernel, H=H, W=W, k=k, d=d, relu=relu)

    out = pl.pallas_call(
        kern,
        out_shape=jax.ShapeDtypeStruct((N, C, HW), x_nchw.dtype),
        grid_spec=pltpu.PrefetchScalarGridSpec(
            num_scalar_prefetch=0,
            grid=(N, n_cblk),
            in_specs=[
                pl.BlockSpec((1, tC, HW), lambda n, ci: (n, ci, 0)),   # activations
                pl.BlockSpec((tC, KK), lambda n, ci: (ci, 0)),         # folded weights
                pl.BlockSpec((tC, 1), lambda n, ci: (ci, 0)),          # folded BN bias
                pl.BlockSpec((KK, HW), lambda n, ci: (0, 0)),          # boundary masks
            ],
            out_specs=pl.BlockSpec((1, tC, HW), lambda n, ci: (n, ci, 0)),
        ),
        compiler_params=pltpu.CompilerParams(
            dimension_semantics=("parallel", "parallel"),
            vmem_limit_bytes=vmem_limit),
    )(x, w_eff, b_eff, m)

    return out.reshape(N, C, H, W)                    # free reshape back to NCHW


def _reference(x_nchw, weight, gamma, beta, running_mean, running_var,
               *, k=3, d=1, relu=False, eps=1e-5):
    C = x_nchw.shape[1]
    p = (k // 2) * d
    y = lax.conv_general_dilated(
        x_nchw, weight, window_strides=(1, 1), padding=[(p, p), (p, p)],
        rhs_dilation=(d, d), dimension_numbers=('NCHW', 'OIHW', 'NCHW'),
        feature_group_count=C)
    inv = 1.0 / jnp.sqrt(running_var + eps)
    y = (y - running_mean[None, :, None, None]) * inv[None, :, None, None]
    y = y * gamma[None, :, None, None] + beta[None, :, None, None]
    if relu:
        y = jnp.maximum(y, 0.0)
    return y


if __name__ == "__main__":
    # Module config: DWConv(channel=4, k=3, d=1, relu=False)
    N, C, H, W = 2, 4, 16, 16
    k, d, relu = 3, 1, False

    key = jax.random.PRNGKey(0)
    kx, kw, kg, kb, km, kv = jax.random.split(key, 6)

    x = jax.random.normal(kx, (N, C, H, W), jnp.float32)
    weight = jax.random.normal(kw, (C, 1, k, k), jnp.float32) * 0.1    # depthwise filter
    gamma = jax.random.normal(kg, (C,), jnp.float32) * 0.1 + 1.0        # BN weight
    beta = jax.random.normal(kb, (C,), jnp.float32) * 0.1               # BN bias
    running_mean = jax.random.normal(km, (C,), jnp.float32) * 0.1
    running_var = jnp.abs(jax.random.normal(kv, (C,), jnp.float32)) * 0.1 + 0.9

    out = dwconv_bn(x, weight, gamma, beta, running_mean, running_var,
                    k=k, d=d, relu=relu)
    out = jax.block_until_ready(out)

    ref = _reference(x, weight, gamma, beta, running_mean, running_var,
                     k=k, d=d, relu=relu)
    assert out.shape == (N, C, H, W)
    assert jnp.allclose(out, ref, atol=1e-4, rtol=1e-4), "mismatch vs reference"

    print("KERNEL_OK")
</pallas_src>

<mosaic_0001>
module attributes {stable_mosaic.version = 11 : i64} {
  func.func @_dwconv_bn_kernel(%arg0: i32, %arg1: i32, %arg2: memref<1x4x256xf32, #tpu.memory_space<vmem>>, %arg3: memref<4x9xf32, #tpu.memory_space<vmem>>, %arg4: memref<4x1xf32, #tpu.memory_space<vmem>>, %arg5: memref<9x256xf32, #tpu.memory_space<vmem>>, %arg6: memref<1x4x256xf32, #tpu.memory_space<vmem>>) attributes {dimension_semantics = [#tpu.dimension_semantics<parallel>, #tpu.dimension_semantics<parallel>], iteration_bounds = array<i64: 2, 1>, scalar_prefetch = 0 : i64, scratch_operands = 0 : i64, tpu.core_type = #tpu.core_type<tc>, window_params = [{transform_indices = @transform_0, window_bounds = array<i64: 1, 4, 256>}, {transform_indices = @transform_1, window_bounds = array<i64: 4, 9>}, {transform_indices = @transform_2, window_bounds = array<i64: 4, 1>}, {pipeline_mode = #tpu.pipeline_mode<synchronous>, transform_indices = @transform_3, window_bounds = array<i64: 9, 256>}, {transform_indices = @transform_4, window_bounds = array<i64: 1, 4, 256>}]} {
    %c0 = arith.constant 0 : index
    %c0_0 = arith.constant 0 : index
    %c0_1 = arith.constant 0 : index
    %0 = vector.load %arg2[%c0, %c0_0, %c0_1] : memref<1x4x256xf32, #tpu.memory_space<vmem>>, vector<1x4x256xf32>
    %1 = vector.shape_cast %0 : vector<1x4x256xf32> to vector<4x256xf32>
    %c0_2 = arith.constant 0 : index
    %c0_3 = arith.constant 0 : index
    %2 = vector.load %arg3[%c0_2, %c0_3] : memref<4x9xf32, #tpu.memory_space<vmem>>, vector<4x9xf32>
    %c0_4 = arith.constant 0 : index
    %c0_5 = arith.constant 0 : index
    %3 = vector.load %arg5[%c0_4, %c0_5] : memref<9x256xf32, #tpu.memory_space<vmem>>, vector<9x256xf32>
    %c0_6 = arith.constant 0 : index
    %c0_7 = arith.constant 0 : index
    %4 = vector.load %arg4[%c0_6, %c0_7] : memref<4x1xf32, #tpu.memory_space<vmem>>, vector<4x1xf32>
    %5 = vector.shape_cast %4 : vector<4x1xf32> to vector<4x1xf32>
    %6 = vector.broadcast %5 : vector<4x1xf32> to vector<4x256xf32>
    %c17_i32 = arith.constant 17 : i32
    %7 = tpu.dynamic_rotate %1 by %c17_i32 dim 1 : vector<4x256xf32>, i32 -> vector<4x256xf32>
    %8 = vector.extract_strided_slice %3 {offsets = [0, 0], sizes = [1, 256], strides = [1, 1]} : vector<9x256xf32> to vector<1x256xf32>
    %9 = vector.broadcast %8 : vector<1x256xf32> to vector<4x256xf32>
    %10 = arith.mulf %7, %9 : vector<4x256xf32>
    %11 = vector.extract_strided_slice %2 {offsets = [0, 0], sizes = [4, 1], strides = [1, 1]} : vector<4x9xf32> to vector<4x1xf32>
    %12 = vector.broadcast %11 : vector<4x1xf32> to vector<4x256xf32>
    %13 = arith.mulf %10, %12 : vector<4x256xf32>
    %14 = arith.addf %6, %13 : vector<4x256xf32>
    %c16_i32 = arith.constant 16 : i32
    %15 = tpu.dynamic_rotate %1 by %c16_i32 dim 1 : vector<4x256xf32>, i32 -> vector<4x256xf32>
    %16 = vector.extract_strided_slice %3 {offsets = [1, 0], sizes = [1, 256], strides = [1, 1]} : vector<9x256xf32> to vector<1x256xf32>
    %17 = vector.broadcast %16 : vector<1x256xf32> to vector<4x256xf32>
    %18 = arith.mulf %15, %17 : vector<4x256xf32>
    %19 = vector.extract_strided_slice %2 {offsets = [0, 1], sizes = [4, 1], strides = [1, 1]} : vector<4x9xf32> to vector<4x1xf32>
    %20 = vector.broadcast %19 : vector<4x1xf32> to vector<4x256xf32>
    %21 = arith.mulf %18, %20 : vector<4x256xf32>
    %22 = arith.addf %14, %21 : vector<4x256xf32>
    %c15_i32 = arith.constant 15 : i32
    %23 = tpu.dynamic_rotate %1 by %c15_i32 dim 1 : vector<4x256xf32>, i32 -> vector<4x256xf32>
    %24 = vector.extract_strided_slice %3 {offsets = [2, 0], sizes = [1, 256], strides = [1, 1]} : vector<9x256xf32> to vector<1x256xf32>
    %25 = vector.broadcast %24 : vector<1x256xf32> to vector<4x256xf32>
    %26 = arith.mulf %23, %25 : vector<4x256xf32>
    %27 = vector.extract_strided_slice %2 {offsets = [0, 2], sizes = [4, 1], strides = [1, 1]} : vector<4x9xf32> to vector<4x1xf32>
    %28 = vector.broadcast %27 : vector<4x1xf32> to vector<4x256xf32>
    %29 = arith.mulf %26, %28 : vector<4x256xf32>
    %30 = arith.addf %22, %29 : vector<4x256xf32>
    %c1_i32 = arith.constant 1 : i32
    %31 = tpu.dynamic_rotate %1 by %c1_i32 dim 1 : vector<4x256xf32>, i32 -> vector<4x256xf32>
    %32 = vector.extract_strided_slice %3 {offsets = [3, 0], sizes = [1, 256], strides = [1, 1]} : vector<9x256xf32> to vector<1x256xf32>
    %33 = vector.broadcast %32 : vector<1x256xf32> to vector<4x256xf32>
    %34 = arith.mulf %31, %33 : vector<4x256xf32>
    %35 = vector.extract_strided_slice %2 {offsets = [0, 3], sizes = [4, 1], strides = [1, 1]} : vector<4x9xf32> to vector<4x1xf32>
    %36 = vector.broadcast %35 : vector<4x1xf32> to vector<4x256xf32>
    %37 = arith.mulf %34, %36 : vector<4x256xf32>
    %38 = arith.addf %30, %37 : vector<4x256xf32>
    %39 = vector.extract_strided_slice %2 {offsets = [0, 4], sizes = [4, 1], strides = [1, 1]} : vector<4x9xf32> to vector<4x1xf32>
    %40 = vector.broadcast %39 : vector<4x1xf32> to vector<4x256xf32>
    %41 = arith.mulf %1, %40 : vector<4x256xf32>
    %42 = arith.addf %38, %41 : vector<4x256xf32>
    %c255_i32 = arith.constant 255 : i32
    %43 = tpu.dynamic_rotate %1 by %c255_i32 dim 1 : vector<4x256xf32>, i32 -> vector<4x256xf32>
    %44 = vector.extract_strided_slice %3 {offsets = [5, 0], sizes = [1, 256], strides = [1, 1]} : vector<9x256xf32> to vector<1x256xf32>
    %45 = vector.broadcast %44 : vector<1x256xf32> to vector<4x256xf32>
    %46 = arith.mulf %43, %45 : vector<4x256xf32>
    %47 = vector.extract_strided_slice %2 {offsets = [0, 5], sizes = [4, 1], strides = [1, 1]} : vector<4x9xf32> to vector<4x1xf32>
    %48 = vector.broadcast %47 : vector<4x1xf32> to vector<4x256xf32>
    %49 = arith.mulf %46, %48 : vector<4x256xf32>
    %50 = arith.addf %42, %49 : vector<4x256xf32>
    %c241_i32 = arith.constant 241 : i32
    %51 = tpu.dynamic_rotate %1 by %c241_i32 dim 1 : vector<4x256xf32>, i32 -> vector<4x256xf32>
    %52 = vector.extract_strided_slice %3 {offsets = [6, 0], sizes = [1, 256], strides = [1, 1]} : vector<9x256xf32> to vector<1x256xf32>
    %53 = vector.broadcast %52 : vector<1x256xf32> to vector<4x256xf32>
    %54 = arith.mulf %51, %53 : vector<4x256xf32>
    %55 = vector.extract_strided_slice %2 {offsets = [0, 6], sizes = [4, 1], strides = [1, 1]} : vector<4x9xf32> to vector<4x1xf32>
    %56 = vector.broadcast %55 : vector<4x1xf32> to vector<4x256xf32>
    %57 = arith.mulf %54, %56 : vector<4x256xf32>
    %58 = arith.addf %50, %57 : vector<4x256xf32>
    %c240_i32 = arith.constant 240 : i32
    %59 = tpu.dynamic_rotate %1 by %c240_i32 dim 1 : vector<4x256xf32>, i32 -> vector<4x256xf32>
    %60 = vector.extract_strided_slice %3 {offsets = [7, 0], sizes = [1, 256], strides = [1, 1]} : vector<9x256xf32> to vector<1x256xf32>
    %61 = vector.broadcast %60 : vector<1x256xf32> to vector<4x256xf32>
    %62 = arith.mulf %59, %61 : vector<4x256xf32>
    %63 = vector.extract_strided_slice %2 {offsets = [0, 7], sizes = [4, 1], strides = [1, 1]} : vector<4x9xf32> to vector<4x1xf32>
    %64 = vector.broadcast %63 : vector<4x1xf32> to vector<4x256xf32>
    %65 = arith.mulf %62, %64 : vector<4x256xf32>
    %66 = arith.addf %58, %65 : vector<4x256xf32>
    %c239_i32 = arith.constant 239 : i32
    %67 = tpu.dynamic_rotate %1 by %c239_i32 dim 1 : vector<4x256xf32>, i32 -> vector<4x256xf32>
    %68 = vector.extract_strided_slice %3 {offsets = [8, 0], sizes = [1, 256], strides = [1, 1]} : vector<9x256xf32> to vector<1x256xf32>
    %69 = vector.broadcast %68 : vector<1x256xf32> to vector<4x256xf32>
    %70 = arith.mulf %67, %69 : vector<4x256xf32>
    %71 = vector.extract_strided_slice %2 {offsets = [0, 8], sizes = [4, 1], strides = [1, 1]} : vector<4x9xf32> to vector<4x1xf32>
    %72 = vector.broadcast %71 : vector<4x1xf32> to vector<4x256xf32>
    %73 = arith.mulf %70, %72 : vector<4x256xf32>
    %74 = arith.addf %66, %73 : vector<4x256xf32>
    %c0_8 = arith.constant 0 : index
    %c0_9 = arith.constant 0 : index
    %c0_10 = arith.constant 0 : index
    %75 = vector.load %arg6[%c0_8, %c0_9, %c0_10] : memref<1x4x256xf32, #tpu.memory_space<vmem>>, vector<1x4x256xf32>
    %76 = vector.shape_cast %75 : vector<1x4x256xf32> to vector<4x256xf32>
    %77 = vector.shape_cast %74 : vector<4x256xf32> to vector<1x4x256xf32>
    tpu.vector_store %arg6[%c0_8, %c0_9, %c0_10], %77 {strides = array<i32>} : memref<1x4x256xf32, #tpu.memory_space<vmem>>, vector<1x4x256xf32>,
    return
  }
  func.func @transform_0(%arg0: i32, %arg1: i32) -> (i32, i32, i32) {
    %c0_i32 = arith.constant 0 : i32
    %c0_i32_0 = arith.constant 0 : i32
    return %arg0, %arg1, %c0_i32 : i32, i32, i32
  }
  func.func @transform_1(%arg0: i32, %arg1: i32) -> (i32, i32) {
    %c0_i32 = arith.constant 0 : i32
    %c0_i32_0 = arith.constant 0 : i32
    return %arg1, %c0_i32 : i32, i32
  }
  func.func @transform_2(%arg0: i32, %arg1: i32) -> (i32, i32) {
    %c0_i32 = arith.constant 0 : i32
    %c0_i32_0 = arith.constant 0 : i32
    return %arg1, %c0_i32 : i32, i32
  }
  func.func @transform_3(%arg0: i32, %arg1: i32) -> (i32, i32) {
    %c0_i32 = arith.constant 0 : i32
    %c0_i32_0 = arith.constant 0 : i32
    %c0_i32_1 = arith.constant 0 : i32
    return %c0_i32, %c0_i32_0 : i32, i32
  }
  func.func @transform_4(%arg0: i32, %arg1: i32) -> (i32, i32, i32) {
    %c0_i32 = arith.constant 0 : i32
    %c0_i32_0 = arith.constant 0 : i32
    return %arg0, %arg1, %c0_i32 : i32, i32, i32
  }
}

</mosaic_0001>

<bundles_post_ra>
// kernel: tpu_custom_call.1
= control target key start
LH: loop header
LB: loop body
LE: loop exit
PB: predicated region body
PF: predicated region fallthrough
CT: control target
= control target key end

     0   :  { %9 = vsyncpa [#allocation3], 0  ;;  %s1288_s0 = inlined_call_operand.hbm [shape: f32[2,4,256], index: 0, kind: input, shape index: {}]   ;;  %s1289_s1 = inlined_call_operand.vmem [shape: f32[4,9], index: 1, kind: input, shape index: {}]   ;;  %s1290_s2 = inlined_call_operand.vmem [shape: f32[4,1], index: 2, kind: input, shape index: {}]   ;;  %s1291_s3 = inlined_call_operand.hbm [shape: f32[9,256], index: 3, kind: input, shape index: {}]   ;;  %s1292_s4 = inlined_call_operand.hbm [shape: f32[2,4,256], index: 4, kind: output, shape index: {}]  }
   0x1   :  { %11 = vsyncpa [#allocation3 + $0x1], 0 }
   0x2   :  { %12 = vsyncpa [#allocation6], 0 }
   0x3   :  { %13 = vsyncpa [#allocation4], 0 }
   0x4   :  { %15 = vsyncpa [#allocation4 + $0x1], 0  ;;  %s982_s15 = smov 0   ;;  %s984_s16 = smov 0  }
   0x5   :  { %s986_s17 = smov 0   ;;  %s988_s18 = smov 0  }
   0x6   :  { %s990_s19 = smov 0   ;;  %s992_s20 = smov 0  }
   0x7 LB: > { %s662_s21 = sadd.s32 4294967295, %s932_s20   ;;  %s663_s22 = sadd.s32 4294967294, %s932_s20   ;;  %s932_s20 = sphi %s992_s20, %s21_s20   ;;  %s928_s19 = sphi %s990_s19, %s1316_s19   ;;  %s924_s18 = sphi %s988_s18, %s1315_s18   ;;  %s920_s17 = sphi %s986_s17, %s1314_s17   ;;  %s916_s16 = sphi %s984_s16, %s1313_s16   ;;  %s912_s15 = sphi %s982_s15, %s1312_s15  }
   0x8   : > { %p55_p0 = scmp.ne.s32.totalorder %s916_s16, %s912_s15  ;;  %p1016_p1 = scmp.eq.s32.totalorder %s662_s21, 0 }
   0x9   : > { %p1020_p2 = scmp.eq.s32.totalorder %s662_s21, 1  ;;  %p160_p3 = scmp.eq.s32.totalorder %s663_s22, 1 }
   0xa   : > { %s1297_s23 = scalar_select %p1016_p1, 1, 0 }
   0xb   : > { %s1298_s24 = scalar_select %p1020_p2, 1, 0 }
   0xc   : > { %p1026_p4 = por %p1016_p1, %p55_p0  ;;  %p664_p5 = scmp.ge.s32.totalorder %s932_s20, 1 }
   0xd   : > { %p1031_p6 = por %p160_p3, %p55_p0  ;;  %p167_p7 = scmp.lt.s32.totalorder %s932_s20, 3 }
   0xe   : > { %s1299_s25 = scalar_select %p1026_p4, 1, 0 }
   0xf   : > { %s1300_s26 = scalar_select %p1031_p6, 1, 0 }
  0x10   : > { %p1036_p8 = pnand %p664_p5, %p167_p7  ;;  %s934_s28 = smov [#allocation5]  }
  0x11   : > { %s193_s29 = sshll.u32 %s934_s28, 4  ;;  %s33_s5 = sadd.s32 1, %s928_s19  ;;  %s194_s29 = int_to_ptr.vmem [resolvable:$true] %s193_s29 }
  0x12   : > { %s1301_s27 = scalar_select %p1036_p8, 1, 0 }
  0x13   : > { %p693_p9 = pneg %p1036_p8  ;;  %s788_s8 = scalar_lea.hbm %s1291_s3, 512 }
  0x14   : > { %p789_p12 = scmp.ne.s32.totalorder %s1291_s3, %s788_s8  ;;  %p795_p5 = scmp.lt.u32.totalorder %s788_s8, %s1291_s3 }
  0x15   : > { %p1045_p11 = pnand %p693_p9, %p1016_p1 }
  0x17   : > { %p790_p13 = pneg %p1045_p11 }
  0x19   : > { %p791_p0 = pnand %p790_p13, %p789_p12 }
  0x1b   : > { %p792_p3 = pneg %p791_p0 }
  0x1d   : > { %p797_p7 = pnand %p795_p5, %p792_p3 }
  0x1f   : > { %800 = shalt.err (!%p797_p7)
}
  0x20   : > { %s801_s13 = scalar_lea.vmem %s194_s29, 512  ;;  %p809_p1 = scmp.lt.s32.totalorder %s194_s29, %s194_s29 }
  0x21   : > { %p802_p9 = scmp.ne.s32.totalorder %s194_s29, %s801_s13  ;;  %p810_p4 = scmp.lt.s32.totalorder %s801_s13, %s801_s13 }
  0x23   : > { %p804_p10 = pnand %p802_p9, %p790_p13  ;;  %p811_p8 = por %p810_p4, %p809_p1 }
  0x25   : > { %p805_p6 = pneg %p804_p10 }
  0x27   : > { %p812_p2 = pnand %p811_p8, %p805_p6 }
  0x29   : > { %815 = shalt.err (!%p812_p2)
}
  0x2a   : > { %s935_s14 = smov 256   ;;  %s936_s21 = smov 16  }
  0x2b   : > { %696 = dma.hbm_to_vmem [thread:$0]  (!%p1045_p11), %s1291_s3, 512, %s194_s29, [#allocation6], %s935_s14, %s935_s14, %s936_s21  }
  0x2c   : > { %p35_p1 = scmp.ge.s32.totalorder %s33_s5, 2  ;;  %s42_s6 = sadd.s32 1, %s920_s17 }
  0x2d   : > { %p49_p2 = scmp.ne.s32.totalorder %s920_s17, %s916_s16  ;;  %p50_p4 = scmp.eq.s32.totalorder %s932_s20, 0 }
  0x2e   : > { %s1318_s5 = smov (%p35_p1, %s33_s5), 0  ;;  %p1304_p8 = scmp.ne.s32.totalorder %s1298_s24, 0 }
  0x2f   : > { %p1072_p6 = por %p50_p4, %p49_p2  ;;  %s37_s30 = ssub.s32 %s928_s19, %s1318_s5 }
  0x30   : > { %p1078_p10 = por %p1304_p8, %p49_p2  ;;  %p706_p12 = scmp.lt.s32.totalorder %s932_s20, 2 }
  0x31   : > { %p40_p11 = scmp.eq.s32.totalorder %s37_s30, 0  ;;  %s207_s29 = sand.u32 1, %s920_s17  }
  0x32   : > { %s669_s9 = sshll.u32 %s207_s29, 3  ;;  %s683_s11 = sshll.u32 %s928_s19, 7 }
  0x33   : > { %s1087_s10 = scalar_select %p40_p11, %s920_s17, %s42_s6  }
  0x34   : > { %s1093_s14 = scalar_lea.hbm %s1288_s0, %s683_s11  ;;  %s211_s24 = scalar_lea.vmem [#allocation2], %s669_s9 }
  0x35   : > { %s221_s21 = sshll.u32 %s211_s24, 4  ;;  %p1099_p13 = pnand %p706_p12, %p1072_p6  ;;  %s1095_s21 = int_to_ptr.vmem [resolvable:$true] %s221_s21 }
  0x36   : > { %s208_s28 = scalar_lea.sflag [#allocation3], %s207_s29  ;;  %s816_s6 = scalar_lea.hbm %s1093_s14, 128 }
  0x37   : > { %p817_p0 = scmp.ne.s32.totalorder %s1093_s14, %s816_s6  ;;  %p818_p3 = pneg %p1099_p13 }
  0x38   : > { %s821_s11 = scalar_lea.hbm %s1288_s0, 256  ;;  %p822_p9 = scmp.lt.u32.totalorder %s1093_s14, %s1288_s0 }
  0x39   : > { %p819_p5 = pnand %p818_p3, %p817_p0  ;;  %p823_p1 = scmp.lt.u32.totalorder %s821_s11, %s816_s6 }
  0x3a   : > { %p825_p4 = scmp.lt.u32.totalorder %s816_s6, %s1093_s14 }
  0x3b   : > { %p820_p7 = pneg %p819_p5  ;;  %p824_p2 = por %p823_p1, %p822_p9 }
  0x3d   : > { %p826_p6 = por %p825_p4, %p824_p2 }
  0x3f   : > { %p827_p8 = pnand %p826_p6, %p820_p7 }
  0x41   : > { %830 = shalt.err (!%p827_p8)
}
  0x42   : > { %s831_s29 = scalar_lea.vmem %s1095_s21, 128  ;;  %s937_s13 = smov [#allocation2]  }
  0x43   : > { %p832_p12 = scmp.ne.s32.totalorder %s1095_s21, %s831_s29  ;;  %s836_s24 = sshll.u32 %s937_s13, 4  ;;  %s837_s24 = int_to_ptr.vmem [resolvable:$false] %s836_s24 }
  0x44   : > { %s838_s30 = scalar_lea.vmem %s837_s24, 256  ;;  %p839_p5 = scmp.lt.s32.totalorder %s1095_s21, %s837_s24 }
  0x45   : > { %p834_p11 = pnand %p832_p12, %p818_p3  ;;  %p840_p9 = scmp.lt.s32.totalorder %s838_s30, %s831_s29 }
  0x47   : > { %p835_p0 = pneg %p834_p11  ;;  %p841_p1 = por %p840_p9, %p839_p5 }
  0x49   : > { %p842_p2 = pnand %p841_p1, %p835_p0 }
  0x4b   : > { %845 = shalt.err (!%p842_p2)
}
  0x4c   : > { %700 = dma.hbm_to_vmem [thread:$0]  (!%p1099_p13), %s1093_s14, 128, %s1095_s21, %s208_s28  }
  0x4d   : > { %p1307_p7 = scmp.ne.s32.totalorder %s1301_s27, 0 }
  0x4e   : > { %s1131_s6 = sand.u32 (!%p1307_p7), 1, %s916_s16   ;;  %p1308_p3 = scmp.ne.s32.totalorder (!%p1307_p7), %s1299_s25, 0 }
  0x4f   : > { %230 = sbr.rel (%p1307_p7) target bundleno = 299 (0x12b), region = 36  ;;  %s673_s9 = sshll.u32 (!%p1307_p7), %s1131_s6, 3 }
  0x50   : > { %s233_s11 = scalar_lea.sflag (!%p1307_p7), [#allocation3], %s1131_s6  ;;  %s236_s7 = scalar_lea.vmem (!%p1307_p7), [#allocation2], %s673_s9 }
  0x56   : > { %899 = dma.done.wait (%p1308_p3), %s233_s11, 128  }
  0x57   : > { %901 = vsyncadd (%p1308_p3), %s233_s11, 4294967168  ;;  %p1309_p13 = scmp.ne.s32.totalorder %s1297_s23, 0 }
  0x59   : > { %903 = dma.done.wait (%p1309_p13), [#allocation6], 512  }
  0x5a   : > { %905 = vsyncadd (%p1309_p13), [#allocation6], 4294966784  ;;  %v938_v0 = vmov 1   ;;  %v939_v1 = vmov 0   ;;  %v282_v2 = vld [vmem:[%s1289_s1] sm:$0xf]  ;;  %v300_v22 = vlaneseq }
  0x5b   : > { %779 = vset.pattern.permute.xlu1 %v938_v0  ;;  %778 = vset.pattern.permute.xlu0 %v939_v1  ;;  %v287_v3 = vld [vmem:[%s1290_s2] sm:$0xf]  ;;  %s940_s25 = smov 17   ;;  %v941_v6 = vmov 2   ;;  %v942_v7 = vmov 4   ;;  %s943_s23 = smov 16  }
  0x5c   : > { %342 = vperm.xlu1 %779, %v282_v2   ;;  %317 = vperm.xlu0 %778, %v282_v2   ;;  %v1151_v4 = vld [vmem:[%s236_s7] sm:$0xff]  ;;  %v944_v8 = vmov 6   ;;  %v945_v9 = vmov 3   ;;  %s946_s28 = smov 15   ;;  %s947_s12 = smov 1   ;;  %v948_v10 = vmov 5  }
  0x5d   : > { %v294_v5 = vcombine.high %v1151_v4, %v1151_v4  ;;  %s949_s29 = smov 127   ;;  %v950_v11 = vmov 8   ;;  %s951_s13 = smov 113   ;;  %v952_v12 = vmov 7   ;;  %v1171_v25 = vshrl.u32 %v300_v22, 7  ;;  %v1176_v30 = vld [vmem:[#allocation5] sm:$0xff] }
  0x5e   : > { %s953_s24 = smov 111   ;;  %s954_s30 = smov 112   ;;  %v1173_v26 = vand.u32 127, %v300_v22  ;;  %v1178_v31 = vld [vmem:[#allocation5 + $0x8] sm:$0xff]  ;;  %v955_v32 = vmov 839922192  }
  0x5f   : > { %v307_v28 = vsub.s32 0, %v1171_v25  ;;  %v403_v33 = vunpack.c.l.s4 %v955_v32  ;;  %v333_v34 = vsub.s32 1, %v1171_v25  ;;  %v358_v40 = vsub.s32 2, %v1171_v25  ;;  %s684_s11 = sshll.u32 %s924_s18, 7  ;;  %s272_s7 = scalar_lea.vmem [#allocation7], %s673_s9 }
  0x60   : > { %290 = vperm.xlu0 %778, %v287_v3   ;;  %296 = vrot.lane.b32.xlu1 %v1151_v4, %s940_s25  ;;  %vm302_vm0 = vcmp.lt.s32.totalorder %v1173_v26, 17  ;;  %vm328_vm1 = vcmp.lt.s32.totalorder %v1173_v26, 16  ;;  %vm353_vm2 = vcmp.lt.s32.totalorder %v1173_v26, 15  ;;  %v383_v48 = vsub.s32 3, %v1171_v25  ;;  %s538_s27 = sshll.u32 %s272_s7, 4  ;;  %s1239_s22 = scalar_lea.hbm %s1292_s4, %s684_s11  ;;  %s1241_s27 = int_to_ptr.vmem [resolvable:$true] %s538_s27 }
  0x61   : > { %780 = vset.pattern.permute.xlu1 %v941_v6  ;;  %v308_v36 = vrot.slane %v1176_v30, %v307_v28  ;;  %v312_v37 = vrot.slane %v1178_v31, %v307_v28  ;;  %v404_v41 = vunpack.c.0.s8 %v403_v33  ;;  %v334_v42 = vrot.slane %v1176_v30, %v333_v34  ;;  %s956_s18 = smov [#allocation7]  }
  0x62   : > { %v338_v43 = vrot.slane %v1178_v31, %v333_v34  ;;  %v359_v51 = vrot.slane %v1176_v30, %v358_v40  ;;  %v363_v52 = vrot.slane %v1178_v31, %v358_v40  ;;  %vm378_vm3 = vcmp.lt.s32.totalorder %v1173_v26, 1  ;;  %s850_s9 = sshll.u32 %s956_s18, 4  ;;  %s851_s9 = int_to_ptr.vmem [resolvable:$false] %s850_s9 }
  0x63   : > { %v407_v58 = vsub.s32 %v404_v41, %v1171_v25  ;;  %v384_v59 = vrot.slane %v1176_v30, %v383_v48  ;;  %v388_v60 = vrot.slane %v1178_v31, %v383_v48  ;;  %vm420_vm4 = vcmp.lt.s32.totalorder %v1173_v26, 127  ;;  %p853_p12 = scmp.lt.s32.totalorder %s1241_s27, %s851_s9 }
  0x64   : > { %367 = vperm.xlu1 %780, %v282_v2   ;;  %298 = vrot.lane.b32.xlu0 %v294_v5, %s940_s25  ;;  %vm445_vm5 = vcmp.lt.s32.totalorder %v1173_v26, 113  ;;  %vm470_vm6 = vcmp.lt.s32.totalorder %v1173_v26, 112  ;;  %vm495_vm7 = vcmp.lt.s32.totalorder %v1173_v26, 111  ;;  %s522_s25 = scalar_lea.sflag [#allocation4], %s1131_s6 }
  0x65   : > { %781 = vset.pattern.permute.xlu0 %v942_v7 }
  0x68   : > { %324 = vrot.lane.b32.xlu1 %v1151_v4, %s943_s23  ;;  %400 = vperm.xlu0 %781, %v282_v2  }
  0x69   : > { %784 = vset.pattern.permute.xlu1 %v944_v8 }
  0x6c   : > { %326 = vrot.lane.b32.xlu1 %v294_v5, %s943_s23  ;;  %782 = vset.pattern.permute.xlu0 %v945_v9  ;;  %s846_s23 = scalar_lea.vmem %s1241_s27, 128 }
  0x6d   : > { %392 = vperm.xlu0 %782, %v282_v2   ;;  %p847_p4 = scmp.ne.s32.totalorder %s1241_s27, %s846_s23 }
  0x6f   : > { %p848_p6 = pnand %p847_p4, %p1078_p10 }
  0x70   : > { %349 = vrot.lane.b32.xlu1 %v1151_v4, %s946_s28 }
  0x71   : > { %374 = vrot.lane.b32.xlu0 %v1151_v4, %s947_s12  ;;  %p849_p8 = pneg %p848_p6 }
  0x72   : > { %783 = vset.pattern.permute.xlu0 %v948_v10 }
  0x74   : > { %351 = vrot.lane.b32.xlu1 %v294_v5, %s946_s28  ;;  %s852_s28 = scalar_lea.vmem %s851_s9, 256 }
  0x75   : > { %434 = vperm.xlu0 %783, %v282_v2   ;;  %p854_p11 = scmp.lt.s32.totalorder %s852_s28, %s846_s23 }
  0x77   : > { %p855_p0 = por %p854_p11, %p853_p12 }
  0x78   : > { %376 = vrot.lane.b32.xlu1 %v294_v5, %s947_s12 }
  0x79   : > { %418 = vrot.lane.b32.xlu0 %v294_v5, %s949_s29  ;;  %p856_p5 = pnand %p855_p0, %p849_p8 }
  0x7a   : > { %786 = vset.pattern.permute.xlu0 %v950_v11 }
  0x7c   : > { %459 = vperm.xlu1 %784, %v282_v2  }
  0x7d   : > { %441 = vrot.lane.b32.xlu0 %v1151_v4, %s951_s13 }
  0x80   : > { %416 = vrot.lane.b32.xlu1 %v1151_v4, %s949_s29 }
  0x81   : > { %785 = vset.pattern.permute.xlu1 %v952_v12  ;;  %509 = vperm.xlu0 %786, %v282_v2  }
  0x84   : > { %484 = vperm.xlu1 %785, %v282_v2  }
  0x85   : > { %491 = vrot.lane.b32.xlu0 %v1151_v4, %s953_s24 }
  0x88   : > { %443 = vrot.lane.b32.xlu1 %v294_v5, %s951_s13 }
  0x8c   : > { %466 = vrot.lane.b32.xlu1 %v1151_v4, %s954_s30 }
  0x90   : > { %468 = vrot.lane.b32.xlu1 %v294_v5, %s954_s30 }
  0x94   : > { %493 = vrot.lane.b32.xlu1 %v294_v5, %s953_s24  ;;  %v425_v5 = vsub.s32 5, %v1171_v25 }
  0xdb   : > { %v343_v13 = vpop.permute.xlu1 %342  ;;  %v318_v14 = vpop.permute.xlu0 %317 }
  0xdf   : > { %v1163_v15 = vpop.permute.xlu0 %290  ;;  %v297_v16 = vpop.permute.xlu1 %296 }
  0xe3   : > { %v1165_v17 = vpop.permute.xlu1 %367  ;;  %v299_v18 = vpop.permute.xlu0 %298 }
  0xe4   : > { %v303_v38 = vsel %vm302_vm0, %v297_v16, %v299_v18  ;;  %v304_v39 = vsel %vm302_vm0, %v299_v18, %v297_v16  ;;  %v450_v16 = vsub.s32 6, %v1171_v25 }
  0xe5   : > { %v313_v49 = vmul.f32 %v308_v36, %v304_v39  ;;  %v314_v50 = vmul.f32 %v312_v37, %v303_v38 }
  0xe6   : > { %v451_v33 = vrot.slane %v1176_v30, %v450_v16  ;;  %v455_v34 = vrot.slane %v1178_v31, %v450_v16 }
  0xe7   : > { %v325_v19 = vpop.permute.xlu1 %324  ;;  %v1167_v20 = vpop.permute.xlu0 %400  ;;  %v320_v61 = vmul.f32 %v318_v14, %v313_v49  ;;  %v321_v62 = vmul.f32 %v318_v14, %v314_v50 }
  0xe8   : > { %v408_v14 = vrot.slane %v1167_v20, %v407_v58 }
  0xe9   : > { %v322_v11 = vadd.f32 %v320_v61, %v1163_v15  ;;  %v323_v12 = vadd.f32 %v321_v62, %v1163_v15  ;;  %v677_v61 = vld [vmem:[#allocation5 + $0x18] ss:$0 sm:$0xff] }
  0xea   : > { %v410_v32 = vmul.f32 %v408_v14, %v1151_v4 }
  0xeb   : > { %v327_v21 = vpop.permute.xlu1 %326 }
  0xec   : > { %v1169_v23 = vpop.permute.xlu0 %392  ;;  %v329_v46 = vsel %vm328_vm1, %v325_v19, %v327_v21  ;;  %v330_v47 = vsel %vm328_vm1, %v327_v21, %v325_v19  ;;  %v426_v21 = vrot.slane %v1176_v30, %v425_v5  ;;  %v412_v50 = vcombine.high %v410_v32, %v410_v32 }
  0xed   : > { %v339_v53 = vmul.f32 %v334_v42, %v330_v47  ;;  %v340_v54 = vmul.f32 %v338_v43, %v329_v46 }
  0xef   : > { %v350_v24 = vpop.permute.xlu1 %349  ;;  %v345_v6 = vmul.f32 %v343_v13, %v339_v53  ;;  %v346_v7 = vmul.f32 %v343_v13, %v340_v54 }
  0xf0   : > { %v375_v29 = vpop.permute.xlu0 %374 }
  0xf1   : > { %v347_v13 = vadd.f32 %v345_v6, %v322_v11  ;;  %v348_v22 = vadd.f32 %v346_v7, %v323_v12 }
  0xf3   : > { %v352_v27 = vpop.permute.xlu1 %351 }
  0xf4   : > { %v1188_v44 = vpop.permute.xlu0 %434  ;;  %v354_v55 = vsel %vm353_vm2, %v350_v24, %v352_v27  ;;  %v355_v56 = vsel %vm353_vm2, %v352_v27, %v350_v24  ;;  %v430_v27 = vrot.slane %v1178_v31, %v425_v5 }
  0xf5   : > { %v364_v2 = vmul.f32 %v359_v51, %v355_v56  ;;  %v365_v3 = vmul.f32 %v363_v52, %v354_v55 }
  0xf7   : > { %v377_v35 = vpop.permute.xlu1 %376  ;;  %v370_v18 = vmul.f32 %v1165_v17, %v364_v2  ;;  %v371_v19 = vmul.f32 %v1165_v17, %v365_v3 }
  0xf8   : > { %v379_v63 = vsel %vm378_vm3, %v375_v29, %v377_v35  ;;  %v380_v0 = vsel %vm378_vm3, %v377_v35, %v375_v29  ;;  %v419_v1 = vpop.permute.xlu0 %418  ;;  %v475_v35 = vsub.s32 7, %v1171_v25 }
  0xf9   : > { %v389_v9 = vmul.f32 %v384_v59, %v380_v0  ;;  %v390_v10 = vmul.f32 %v388_v60, %v379_v63  ;;  %v372_v36 = vadd.f32 %v370_v18, %v347_v13  ;;  %v373_v37 = vadd.f32 %v371_v19, %v348_v22 }
  0xfa   : > { %v476_v48 = vrot.slane %v1176_v30, %v475_v35  ;;  %v480_v49 = vrot.slane %v1178_v31, %v475_v35  ;;  %v676_v31 = vld [vmem:[#allocation5 + $0x10] ss:$0 sm:$0xff] }
  0xfb   : > { %v1190_v45 = vpop.permute.xlu1 %459  ;;  %v395_v15 = vmul.f32 %v1169_v23, %v389_v9  ;;  %v396_v20 = vmul.f32 %v1169_v23, %v390_v10 }
  0xfc   : > { %v442_v24 = vpop.permute.xlu0 %441 }
  0xfd   : > { %v397_v43 = vadd.f32 %v395_v15, %v372_v36  ;;  %v398_v46 = vadd.f32 %v396_v20, %v373_v37 }
  0xff   : > { %v417_v57 = vpop.permute.xlu1 %416  ;;  %v414_v53 = vadd.f32 %v410_v32, %v397_v43  ;;  %v415_v54 = vadd.f32 %v412_v50, %v398_v46 }
 0x100   : > { %v421_v29 = vsel %vm420_vm4, %v417_v57, %v419_v1  ;;  %v422_v17 = vsel %vm420_vm4, %v419_v1, %v417_v57  ;;  %v510_v42 = vpop.permute.xlu0 %509 }
 0x101   : > { %v431_v40 = vmul.f32 %v426_v21, %v421_v29  ;;  %v432_v23 = vmul.f32 %v430_v27, %v422_v17 }
 0x103   : > { %v485_v8 = vpop.permute.xlu1 %484  ;;  %v437_v25 = vmul.f32 %v1188_v44, %v431_v40  ;;  %v438_v51 = vmul.f32 %v1188_v44, %v432_v23 }
 0x104   : > { %v492_v60 = vpop.permute.xlu0 %491 }
 0x105   : > { %v439_v62 = vadd.f32 %v437_v25, %v414_v53  ;;  %v440_v44 = vadd.f32 %v438_v51, %v415_v54 }
 0x107   : > { %v444_v28 = vpop.permute.xlu1 %443 }
 0x108   : > { %v446_v38 = vsel %vm445_vm5, %v442_v24, %v444_v28  ;;  %v447_v39 = vsel %vm445_vm5, %v444_v28, %v442_v24 }
 0x109   : > { %v456_v47 = vmul.f32 %v451_v33, %v446_v38  ;;  %v457_v4 = vmul.f32 %v455_v34, %v447_v39 }
 0x10b   : > { %v467_v41 = vpop.permute.xlu1 %466  ;;  %v462_v57 = vmul.f32 %v1190_v45, %v456_v47  ;;  %v463_v58 = vmul.f32 %v1190_v45, %v457_v4 }
 0x10d   : > { %v464_v5 = vadd.f32 %v462_v57, %v439_v62  ;;  %v465_v45 = vadd.f32 %v463_v58, %v440_v44 }
 0x10f   : > { %v469_v52 = vpop.permute.xlu1 %468 }
 0x110   : > { %v471_v55 = vsel %vm470_vm6, %v467_v41, %v469_v52  ;;  %v472_v56 = vsel %vm470_vm6, %v469_v52, %v467_v41 }
 0x111   : > { %v481_v59 = vmul.f32 %v476_v48, %v471_v55  ;;  %v482_v30 = vmul.f32 %v480_v49, %v472_v56 }
 0x113   : > { %v487_v63 = vmul.f32 %v485_v8, %v481_v59  ;;  %v488_v0 = vmul.f32 %v485_v8, %v482_v30  ;;  %v494_v1 = vpop.permute.xlu1 %493 }
 0x114   : > { %v496_v2 = vsel %vm495_vm7, %v492_v60, %v494_v1  ;;  %v497_v3 = vsel %vm495_vm7, %v494_v1, %v492_v60 }
 0x115   : > { %v506_v6 = vmul.f32 %v676_v31, %v496_v2  ;;  %v507_v7 = vmul.f32 %v677_v61, %v497_v3  ;;  %v489_v9 = vadd.f32 %v487_v63, %v464_v5  ;;  %v490_v10 = vadd.f32 %v488_v0, %v465_v45 }
 0x117   : > { %v512_v11 = vmul.f32 %v510_v42, %v506_v6  ;;  %v513_v12 = vmul.f32 %v510_v42, %v507_v7 }
 0x119   : > { %v514_v8 = vadd.f32 %v512_v11, %v489_v9  ;;  %v515_v14 = vadd.f32 %v513_v12, %v490_v10 }
 0x11b   : > { %v518_v16 = vcombine.low %v514_v8, %v515_v14 }
 0x11d   : > { %520 = vst [vmem:[%s272_s7] sm:$0xff] %v518_v16 }
 0x11e   : > { %859 = shalt.err (!%p856_p5)
}
 0x11f   : > { %s860_s6 = scalar_lea.hbm %s1239_s22, 128  ;;  %s864_s13 = scalar_lea.hbm %s1292_s4, 256 }
 0x120   : > { %p861_p9 = scmp.ne.s32.totalorder %s1239_s22, %s860_s6  ;;  %p865_p7 = scmp.lt.u32.totalorder %s1239_s22, %s1292_s4 }
 0x121   : > { %p866_p3 = scmp.lt.u32.totalorder %s864_s13, %s860_s6  ;;  %p868_p4 = scmp.lt.u32.totalorder %s860_s6, %s1239_s22 }
 0x122   : > { %p862_p1 = pnand %p861_p9, %p1078_p10 }
 0x123   : > { %p867_p13 = por %p866_p3, %p865_p7 }
 0x124   : > { %p863_p2 = pneg %p862_p1 }
 0x125   : > { %p869_p6 = por %p868_p4, %p867_p13 }
 0x127   : > { %p870_p8 = pnand %p869_p6, %p863_p2 }
 0x129   : > { %873 = shalt.err (!%p870_p8)
}
 0x12a   : > { %691 = dma.vmem_to_hbm [thread:$0]  (%p1078_p10), %s1241_s27, 128, %s1239_s22, %s522_s25  }
 0x12b PF: > { %s550_s11 = sand.u32 1, %s912_s15   ;;  %p1310_p12 = scmp.ne.s32.totalorder %s1300_s26, 0 }
 0x12c   : > { %p1311_p11 = scmp.ge.s32.totalorder %s932_s20, 2  ;;  %s551_s7 = scalar_lea.sflag [#allocation4], %s550_s11 }
 0x12e   : > { %p702_p0 = pnand %p1311_p11, %p1310_p12 }
 0x130   : > { %907 = dma.done.wait (!%p702_p0), %s551_s7, 128  }
 0x131   : > { %909 = vsyncadd (!%p702_p0), %s551_s7, 4294967168  ;;  %s21_s20 = sadd.s32 1, %s932_s20   ;;  %s1312_s15 = smov %s916_s16 }
 0x132   : > { %p18_p5 = scmp.ge.s32.totalorder %s21_s20, 4   ;;  %s1313_s16 = smov %s920_s17 }
 0x133   : > { %s1314_s17 = smov %s1087_s10  ;;  %s1315_s18 = smov %s928_s19 }
 0x134   : > { %s1316_s19 = smov %s1318_s5  ;;  %20 = sbr.rel (!%p18_p5) target bundleno = 7 (0x7), region = 91 }
 0x13b   :  { %556 = vsyncpa [#allocation3], 1 }
 0x13c   :  { %558 = vsyncpa [#allocation3 + $0x1], 1 }
 0x13d   :  { %559 = vsyncpa [#allocation6], 1 }
 0x13e   :  { %560 = vsyncpa [#allocation4], 1 }
 0x13f   :  { %562 = vsyncpa [#allocation4 + $0x1], 1 }

</bundles_post_ra>
